<compile_context>
chip_gen: v7x
topology: tpu7x:2x2x1
jax: 0.10.0
libtpu: 0.0.40
codegen_flags: <defaults>
</compile_context>

<pallas_src>
import functools

import jax
import jax.numpy as jnp
from jax.experimental import pallas as pl
from jax.experimental.pallas import tpu as pltpu

_PACK_WIDTH = 128  # lane-dense output slab width


# ------------------------------ Pallas kernel ------------------------------ #

def _drug_fused_kernel(a_ref, x_ref, batch_ref,
                       w1_ref, b1_ref, w2_ref, b2_ref,
                       wl_ref, bl_ref, wh_ref, bh_ref,
                       out_ref, *, num_graphs):
    f32 = jnp.float32

    # ---- backbone: two GCNConv + ReLU layers: relu(A_hat @ (X @ W) + b) --- #
    xw = jnp.dot(x_ref[...], w1_ref[...], preferred_element_type=f32)
    h = jnp.maximum(
        jnp.dot(a_ref[...], xw, preferred_element_type=f32) + b1_ref[...], 0.0)
    hw = jnp.dot(h, w2_ref[...], preferred_element_type=f32)
    h = jnp.maximum(
        jnp.dot(a_ref[...], hw, preferred_element_type=f32) + b2_ref[...], 0.0)

    # ---- 'max_mean' graph pooling: concat([gmp, gap], axis=1) ------------- #
    # Per-graph masked sublane reductions (O(N*H) live memory).  `batch` is a
    # node-major (N, 1) column so masks broadcast against h with no transpose.
    batch_col = batch_ref[...]                                    # (N, 1) int32
    neg_inf = jnp.float32(-jnp.inf)
    mx_rows, mean_rows = [], []
    for g in range(num_graphs):                                   # static unroll
        m = batch_col == g                                        # (N, 1) bool
        cnt = jnp.sum(m.astype(f32), axis=0, keepdims=True)       # (1, 1)
        # segment max (guard: empty graph -> 0, never -inf)
        mx_g = jnp.max(jnp.where(m, h, neg_inf), axis=0, keepdims=True)
        mx_rows.append(jnp.where(cnt > 0.0, mx_g, 0.0))
        # segment mean (EUP approx reciprocal; guard: empty graph -> 0)
        s_g = jnp.sum(jnp.where(m, h, 0.0), axis=0, keepdims=True)
        mean_rows.append(s_g * pl.reciprocal(jnp.maximum(cnt, 1.0), approx=True))
    pooled = jnp.concatenate(
        [jnp.concatenate(mx_rows, axis=0),                        # (G, H)  gmp
         jnp.concatenate(mean_rows, axis=0)],                     # (G, H)  gap
        axis=1)                                                   # (G, 2H)

    # ---- head: linears = linear(128,32) -> relu -> dropout(eval=identity) - #
    x_feature = jnp.maximum(
        jnp.dot(pooled, wl_ref[...], preferred_element_type=f32) + bl_ref[...],
        0.0)                                                      # (G, F_OUT)

    # relu(x_feature) == x_feature (already non-negative); dropout = identity.
    # Packed head: columns [0:F_OUT) pass x_feature through an identity block,
    # columns [F_OUT:F_OUT+L) compute fc(x_feature); rest is zero padding.
    # One MXU matmul -> one unmasked lane-dense (G, 128) store.
    out_ref[...] = (jnp.dot(x_feature, wh_ref[...], preferred_element_type=f32)
                    + bh_ref[...])


# ------------------------------ JAX wrappers ------------------------------- #

def build_normalized_adjacency(edge_index, num_nodes):
    """GCN normalization A_hat = D^{-1/2} (A + I) D^{-1/2} (dense). Static per
    graph batch, so build it once outside the fused forward."""
    src, dst = edge_index
    a = jnp.zeros((num_nodes, num_nodes), jnp.float32).at[src, dst].set(1.0)
    a = jnp.maximum(a, a.T)                        # undirected
    a = a + jnp.eye(num_nodes, dtype=jnp.float32)  # self loops
    deg = jnp.sum(a, axis=1)
    d_inv_sqrt = jnp.where(deg > 0.0, jax.lax.rsqrt(deg), 0.0)  # isolated-node guard
    return d_inv_sqrt[:, None] * a * d_inv_sqrt[None, :]


def pack_head_params(params, pack_width=_PACK_WIDTH):
    """Fold fc into a lane-dense head:  slab = x_feature @ [I | w_fc | 0] + [0 | b_fc | 0]."""
    w_fc, b_fc = params["w_fc"], params["b_fc"]
    f_out, labels = w_fc.shape
    pad = pack_width - f_out - labels
    assert pad >= 0, "packed slab too narrow"
    w_head = jnp.concatenate(
        [jnp.eye(f_out, dtype=jnp.float32), w_fc,
         jnp.zeros((f_out, pad), jnp.float32)], axis=1)           # (F_OUT, 128)
    b_head = jnp.concatenate(
        [jnp.zeros((1, f_out), jnp.float32), b_fc,
         jnp.zeros((1, pad), jnp.float32)], axis=1)               # (1, 128)
    out = dict(params)
    out["w_head"], out["b_head"] = w_head, b_head
    return out


def drug_forward(params, a_hat, x, batch, num_graphs):
    """Fused forward. Returns (logits, x_feature) like Drug.forward."""
    n = x.shape[0]
    f_out = params["w_lin"].shape[1]
    num_labels = params["w_fc"].shape[1]

    batch_col = batch.astype(jnp.int32).reshape(n, 1)

    packed = pl.pallas_call(
        functools.partial(_drug_fused_kernel, num_graphs=num_graphs),
        out_shape=jax.ShapeDtypeStruct((num_graphs, _PACK_WIDTH), jnp.float32),
        in_specs=[pl.BlockSpec(memory_space=pltpu.MemorySpace.VMEM)
                  for _ in range(11)],
        out_specs=pl.BlockSpec(memory_space=pltpu.MemorySpace.VMEM),
    )(a_hat, x, batch_col,
      params["w_gnn1"], params["b_gnn1"],
      params["w_gnn2"], params["b_gnn2"],
      params["w_lin"], params["b_lin"],
      params["w_head"], params["b_head"])

    x_feature = packed[:, :f_out]
    logits = packed[:, f_out:f_out + num_labels]
    return logits, x_feature


def drug_forward_ref(params, a_hat, x, batch, num_graphs):
    """Pure-JAX reference (high-precision matmuls) for validation."""
    dot = functools.partial(jnp.dot, precision=jax.lax.Precision.HIGHEST)
    h = jnp.maximum(dot(a_hat, dot(x, params["w_gnn1"])) + params["b_gnn1"], 0.0)
    h = jnp.maximum(dot(a_hat, dot(h, params["w_gnn2"])) + params["b_gnn2"], 0.0)
    seg_max = jax.ops.segment_max(h, batch, num_segments=num_graphs)
    seg_sum = jax.ops.segment_sum(h, batch, num_segments=num_graphs)
    counts = jax.ops.segment_sum(jnp.ones((h.shape[0],), jnp.float32), batch,
                                 num_segments=num_graphs)
    seg_mean = seg_sum / jnp.maximum(counts, 1.0)[:, None]
    pooled = jnp.concatenate([seg_max, seg_mean], axis=1)
    x_feature = jnp.maximum(dot(pooled, params["w_lin"]) + params["b_lin"], 0.0)
    logits = dot(x_feature, params["w_fc"]) + params["b_fc"]
    return logits, x_feature


# --------------------------------- driver ---------------------------------- #

if __name__ == "__main__":
    N_NODES = 16          # total nodes across the batch
    N_GRAPHS = 2          # two graphs of 8 nodes each
    F_IN = 32             # input_drug_feature_dim
    H_GNN = 64            # gnn hidden/output width
    F_OUT = 32            # output_drug_feature_dim
    NUM_LABELS = 2

    key = jax.random.PRNGKey(0)
    k_x, k1, k2, k3, k4 = jax.random.split(key, 5)

    # node features
    x = jax.random.normal(k_x, (N_NODES, F_IN), jnp.float32)

    # two 8-node ring graphs; batch assigns nodes -> graph ids
    src, dst = [], []
    for g in range(N_GRAPHS):
        base = g * 8
        for i in range(8):
            src.append(base + i)
            dst.append(base + (i + 1) % 8)
    edge_index = (jnp.array(src, jnp.int32), jnp.array(dst, jnp.int32))
    batch = jnp.repeat(jnp.arange(N_GRAPHS, dtype=jnp.int32),
                       N_NODES // N_GRAPHS)

    # deterministic parameter init (synthetic weights, no checkpoint)
    params = {
        "w_gnn1": 0.1 * jax.random.normal(k1, (F_IN, H_GNN), jnp.float32),
        "b_gnn1": jnp.zeros((1, H_GNN), jnp.float32),
        "w_gnn2": 0.1 * jax.random.normal(k2, (H_GNN, H_GNN), jnp.float32),
        "b_gnn2": jnp.zeros((1, H_GNN), jnp.float32),
        "w_lin": 0.1 * jax.random.normal(k3, (2 * H_GNN, F_OUT), jnp.float32),
        "b_lin": jnp.zeros((1, F_OUT), jnp.float32),
        "w_fc": 0.1 * jax.random.normal(k4, (F_OUT, NUM_LABELS), jnp.float32),
        "b_fc": jnp.zeros((1, NUM_LABELS), jnp.float32),
    }

    # One-time preprocessing hoisted out of the forward (static graph / params).
    params = pack_head_params(params)
    a_hat = build_normalized_adjacency(edge_index, N_NODES)

    fwd = jax.jit(functools.partial(drug_forward, num_graphs=N_GRAPHS))
    out, x_feature = fwd(params, a_hat, x, batch)
    jax.block_until_ready((out, x_feature))

    assert out.shape == (N_GRAPHS, NUM_LABELS)
    assert x_feature.shape == (N_GRAPHS, F_OUT)

    # Correctness check vs pure-JAX reference (loose tol: MXU default precision
    # + approx reciprocal in the segment mean).
    out_ref, xf_ref = drug_forward_ref(params, a_hat, x, batch, N_GRAPHS)
    assert jnp.allclose(out, out_ref, atol=5e-2, rtol=5e-2), "logits mismatch"
    assert jnp.allclose(x_feature, xf_ref, atol=5e-2, rtol=5e-2), "x_feature mismatch"

    print("KERNEL_OK")
</pallas_src>

<mosaic_0001>
module attributes {stable_mosaic.version = 11 : i64} {
  func.func @_drug_fused_kernel(%arg0: memref<16x16xf32, #tpu.memory_space<vmem>>, %arg1: memref<16x32xf32, #tpu.memory_space<vmem>>, %arg2: memref<16x1xi32, #tpu.memory_space<vmem>>, %arg3: memref<32x64xf32, #tpu.memory_space<vmem>>, %arg4: memref<1x64xf32, #tpu.memory_space<vmem>>, %arg5: memref<64x64xf32, #tpu.memory_space<vmem>>, %arg6: memref<1x64xf32, #tpu.memory_space<vmem>>, %arg7: memref<128x32xf32, #tpu.memory_space<vmem>>, %arg8: memref<1x32xf32, #tpu.memory_space<vmem>>, %arg9: memref<32x128xf32, #tpu.memory_space<vmem>>, %arg10: memref<1x128xf32, #tpu.memory_space<vmem>>, %arg11: memref<2x128xf32, #tpu.memory_space<vmem>>) attributes {dimension_semantics = [], scalar_prefetch = 0 : i64, scratch_operands = 0 : i64, tpu.core_type = #tpu.core_type<tc>} {
    %c0 = arith.constant 0 : index
    %c0_0 = arith.constant 0 : index
    %0 = vector.load %arg1[%c0, %c0_0] : memref<16x32xf32, #tpu.memory_space<vmem>>, vector<16x32xf32>
    %c0_1 = arith.constant 0 : index
    %c0_2 = arith.constant 0 : index
    %1 = vector.load %arg3[%c0_1, %c0_2] : memref<32x64xf32, #tpu.memory_space<vmem>>, vector<32x64xf32>
    %cst = arith.constant dense<0.000000e+00> : vector<16x64xf32>
    %2 = tpu.matmul %0, %1, %cst {dimension_numbers = #tpu.dot_dimension_numbers<[1], [0], [0], [1], [0, 0, 1, 1], [], []>} : vector<16x32xf32>, vector<32x64xf32>, vector<16x64xf32> -> vector<16x64xf32>
    %c0_3 = arith.constant 0 : index
    %c0_4 = arith.constant 0 : index
    %3 = vector.load %arg0[%c0_3, %c0_4] : memref<16x16xf32, #tpu.memory_space<vmem>>, vector<16x16xf32>
    %cst_5 = arith.constant dense<0.000000e+00> : vector<16x64xf32>
    %4 = tpu.matmul %3, %2, %cst_5 {dimension_numbers = #tpu.dot_dimension_numbers<[1], [0], [0], [1], [0, 0, 1, 1], [], []>} : vector<16x16xf32>, vector<16x64xf32>, vector<16x64xf32> -> vector<16x64xf32>
    %c0_6 = arith.constant 0 : index
    %c0_7 = arith.constant 0 : index
    %5 = vector.load %arg4[%c0_6, %c0_7] : memref<1x64xf32, #tpu.memory_space<vmem>>, vector<1x64xf32>
    %6 = vector.broadcast %5 : vector<1x64xf32> to vector<16x64xf32>
    %7 = arith.addf %4, %6 : vector<16x64xf32>
    %cst_8 = arith.constant 0.000000e+00 : f32
    %8 = vector.broadcast %cst_8 : f32 to vector<16x64xf32>
    %9 = arith.maximumf %7, %8 : vector<16x64xf32>
    %c0_9 = arith.constant 0 : index
    %c0_10 = arith.constant 0 : index
    %10 = vector.load %arg5[%c0_9, %c0_10] : memref<64x64xf32, #tpu.memory_space<vmem>>, vector<64x64xf32>
    %cst_11 = arith.constant dense<0.000000e+00> : vector<16x64xf32>
    %11 = tpu.matmul %9, %10, %cst_11 {dimension_numbers = #tpu.dot_dimension_numbers<[1], [0], [0], [1], [0, 0, 1, 1], [], []>} : vector<16x64xf32>, vector<64x64xf32>, vector<16x64xf32> -> vector<16x64xf32>
    %c0_12 = arith.constant 0 : index
    %c0_13 = arith.constant 0 : index
    %12 = vector.load %arg0[%c0_12, %c0_13] : memref<16x16xf32, #tpu.memory_space<vmem>>, vector<16x16xf32>
    %cst_14 = arith.constant dense<0.000000e+00> : vector<16x64xf32>
    %13 = tpu.matmul %12, %11, %cst_14 {dimension_numbers = #tpu.dot_dimension_numbers<[1], [0], [0], [1], [0, 0, 1, 1], [], []>} : vector<16x16xf32>, vector<16x64xf32>, vector<16x64xf32> -> vector<16x64xf32>
    %c0_15 = arith.constant 0 : index
    %c0_16 = arith.constant 0 : index
    %14 = vector.load %arg6[%c0_15, %c0_16] : memref<1x64xf32, #tpu.memory_space<vmem>>, vector<1x64xf32>
    %15 = vector.broadcast %14 : vector<1x64xf32> to vector<16x64xf32>
    %16 = arith.addf %13, %15 : vector<16x64xf32>
    %cst_17 = arith.constant 0.000000e+00 : f32
    %17 = vector.broadcast %cst_17 : f32 to vector<16x64xf32>
    %18 = arith.maximumf %16, %17 : vector<16x64xf32>
    %c0_18 = arith.constant 0 : index
    %c0_19 = arith.constant 0 : index
    %19 = vector.load %arg2[%c0_18, %c0_19] : memref<16x1xi32, #tpu.memory_space<vmem>>, vector<16x1xi32>
    %c0_i32 = arith.constant 0 : i32
    %20 = vector.broadcast %c0_i32 : i32 to vector<16x1xi32>
    %21 = arith.cmpi eq, %19, %20 : vector<16x1xi32>
    %22 = arith.extui %21 : vector<16x1xi1> to vector<16x1xi32>
    %23 = arith.sitofp %22 : vector<16x1xi32> to vector<16x1xf32>
    %cst_20 = arith.constant dense<0.000000e+00> : vector<1xf32>
    %24 = vector.multi_reduction <add>, %23, %cst_20 [0] : vector<16x1xf32> to vector<1xf32>
    %25 = vector.shape_cast %24 : vector<1xf32> to vector<1x1xf32>
    %cst_21 = arith.constant 0xFF800000 : f32
    %26 = vector.shape_cast %21 : vector<16x1xi1> to vector<16x1xi1>
    %27 = vector.broadcast %26 : vector<16x1xi1> to vector<16x64xi1>
    %28 = vector.broadcast %cst_21 : f32 to vector<16x64xf32>
    %29 = arith.select %27, %18, %28 : vector<16x64xi1>, vector<16x64xf32>
    %cst_22 = arith.constant dense<0xFF800000> : vector<64xf32>
    %30 = vector.multi_reduction <maximumf>, %29, %cst_22 [0] : vector<16x64xf32> to vector<64xf32>
    %31 = vector.shape_cast %30 : vector<64xf32> to vector<1x64xf32>
    %cst_23 = arith.constant 0.000000e+00 : f32
    %32 = vector.broadcast %cst_23 : f32 to vector<1x1xf32>
    %33 = arith.cmpf ogt, %25, %32 : vector<1x1xf32>
    %cst_24 = arith.constant 0.000000e+00 : f32
    %34 = vector.shape_cast %33 : vector<1x1xi1> to vector<1x1xi1>
    %35 = vector.broadcast %34 : vector<1x1xi1> to vector<1x64xi1>
    %36 = vector.broadcast %cst_24 : f32 to vector<1x64xf32>
    %37 = arith.select %35, %31, %36 : vector<1x64xi1>, vector<1x64xf32>
    %cst_25 = arith.constant 0.000000e+00 : f32
    %38 = vector.shape_cast %21 : vector<16x1xi1> to vector<16x1xi1>
    %39 = vector.broadcast %38 : vector<16x1xi1> to vector<16x64xi1>
    %40 = vector.broadcast %cst_25 : f32 to vector<16x64xf32>
    %41 = arith.select %39, %18, %40 : vector<16x64xi1>, vector<16x64xf32>
    %cst_26 = arith.constant dense<0.000000e+00> : vector<64xf32>
    %42 = vector.multi_reduction <add>, %41, %cst_26 [0] : vector<16x64xf32> to vector<64xf32>
    %43 = vector.shape_cast %42 : vector<64xf32> to vector<1x64xf32>
    %cst_27 = arith.constant 1.000000e+00 : f32
    %44 = vector.broadcast %cst_27 : f32 to vector<1x1xf32>
    %45 = arith.maximumf %25, %44 : vector<1x1xf32>
    %46 = tpu.reciprocal %45 {approx = true} : vector<1x1xf32> -> vector<1x1xf32>
    %47 = vector.broadcast %46 : vector<1x1xf32> to vector<1x64xf32>
    %48 = arith.mulf %43, %47 : vector<1x64xf32>
    %c1_i32 = arith.constant 1 : i32
    %49 = vector.broadcast %c1_i32 : i32 to vector<16x1xi32>
    %50 = arith.cmpi eq, %19, %49 : vector<16x1xi32>
    %51 = arith.extui %50 : vector<16x1xi1> to vector<16x1xi32>
    %52 = arith.sitofp %51 : vector<16x1xi32> to vector<16x1xf32>
    %cst_28 = arith.constant dense<0.000000e+00> : vector<1xf32>
    %53 = vector.multi_reduction <add>, %52, %cst_28 [0] : vector<16x1xf32> to vector<1xf32>
    %54 = vector.shape_cast %53 : vector<1xf32> to vector<1x1xf32>
    %cst_29 = arith.constant 0xFF800000 : f32
    %55 = vector.shape_cast %50 : vector<16x1xi1> to vector<16x1xi1>
    %56 = vector.broadcast %55 : vector<16x1xi1> to vector<16x64xi1>
    %57 = vector.broadcast %cst_29 : f32 to vector<16x64xf32>
    %58 = arith.select %56, %18, %57 : vector<16x64xi1>, vector<16x64xf32>
    %cst_30 = arith.constant dense<0xFF800000> : vector<64xf32>
    %59 = vector.multi_reduction <maximumf>, %58, %cst_30 [0] : vector<16x64xf32> to vector<64xf32>
    %60 = vector.shape_cast %59 : vector<64xf32> to vector<1x64xf32>
    %cst_31 = arith.constant 0.000000e+00 : f32
    %61 = vector.broadcast %cst_31 : f32 to vector<1x1xf32>
    %62 = arith.cmpf ogt, %54, %61 : vector<1x1xf32>
    %cst_32 = arith.constant 0.000000e+00 : f32
    %63 = vector.shape_cast %62 : vector<1x1xi1> to vector<1x1xi1>
    %64 = vector.broadcast %63 : vector<1x1xi1> to vector<1x64xi1>
    %65 = vector.broadcast %cst_32 : f32 to vector<1x64xf32>
    %66 = arith.select %64, %60, %65 : vector<1x64xi1>, vector<1x64xf32>
    %cst_33 = arith.constant 0.000000e+00 : f32
    %67 = vector.shape_cast %50 : vector<16x1xi1> to vector<16x1xi1>
    %68 = vector.broadcast %67 : vector<16x1xi1> to vector<16x64xi1>
    %69 = vector.broadcast %cst_33 : f32 to vector<16x64xf32>
    %70 = arith.select %68, %18, %69 : vector<16x64xi1>, vector<16x64xf32>
    %cst_34 = arith.constant dense<0.000000e+00> : vector<64xf32>
    %71 = vector.multi_reduction <add>, %70, %cst_34 [0] : vector<16x64xf32> to vector<64xf32>
    %72 = vector.shape_cast %71 : vector<64xf32> to vector<1x64xf32>
    %cst_35 = arith.constant 1.000000e+00 : f32
    %73 = vector.broadcast %cst_35 : f32 to vector<1x1xf32>
    %74 = arith.maximumf %54, %73 : vector<1x1xf32>
    %75 = tpu.reciprocal %74 {approx = true} : vector<1x1xf32> -> vector<1x1xf32>
    %76 = vector.broadcast %75 : vector<1x1xf32> to vector<1x64xf32>
    %77 = arith.mulf %72, %76 : vector<1x64xf32>
    %78 = tpu.concatenate %37, %66 in 0 : vector<1x64xf32>, vector<1x64xf32> -> vector<2x64xf32>
    %79 = tpu.concatenate %48, %77 in 0 : vector<1x64xf32>, vector<1x64xf32> -> vector<2x64xf32>
    %80 = tpu.concatenate %78, %79 in 1 : vector<2x64xf32>, vector<2x64xf32> -> vector<2x128xf32>
    %c0_36 = arith.constant 0 : index
    %c0_37 = arith.constant 0 : index
    %81 = vector.load %arg7[%c0_36, %c0_37] : memref<128x32xf32, #tpu.memory_space<vmem>>, vector<128x32xf32>
    %cst_38 = arith.constant dense<0.000000e+00> : vector<2x32xf32>
    %82 = tpu.matmul %80, %81, %cst_38 {dimension_numbers = #tpu.dot_dimension_numbers<[1], [0], [0], [1], [0, 0, 1, 1], [], []>} : vector<2x128xf32>, vector<128x32xf32>, vector<2x32xf32> -> vector<2x32xf32>
    %c0_39 = arith.constant 0 : index
    %c0_40 = arith.constant 0 : index
    %83 = vector.load %arg8[%c0_39, %c0_40] : memref<1x32xf32, #tpu.memory_space<vmem>>, vector<1x32xf32>
    %84 = vector.broadcast %83 : vector<1x32xf32> to vector<2x32xf32>
    %85 = arith.addf %82, %84 : vector<2x32xf32>
    %cst_41 = arith.constant 0.000000e+00 : f32
    %86 = vector.broadcast %cst_41 : f32 to vector<2x32xf32>
    %87 = arith.maximumf %85, %86 : vector<2x32xf32>
    %c0_42 = arith.constant 0 : index
    %c0_43 = arith.constant 0 : index
    %88 = vector.load %arg9[%c0_42, %c0_43] : memref<32x128xf32, #tpu.memory_space<vmem>>, vector<32x128xf32>
    %cst_44 = arith.constant dense<0.000000e+00> : vector<2x128xf32>
    %89 = tpu.matmul %87, %88, %cst_44 {dimension_numbers = #tpu.dot_dimension_numbers<[1], [0], [0], [1], [0, 0, 1, 1], [], []>} : vector<2x32xf32>, vector<32x128xf32>, vector<2x128xf32> -> vector<2x128xf32>
    %c0_45 = arith.constant 0 : index
    %c0_46 = arith.constant 0 : index
    %90 = vector.load %arg10[%c0_45, %c0_46] : memref<1x128xf32, #tpu.memory_space<vmem>>, vector<1x128xf32>
    %91 = vector.broadcast %90 : vector<1x128xf32> to vector<2x128xf32>
    %92 = arith.addf %89, %91 : vector<2x128xf32>
    %c0_47 = arith.constant 0 : index
    %c0_48 = arith.constant 0 : index
    %93 = vector.load %arg11[%c0_47, %c0_48] : memref<2x128xf32, #tpu.memory_space<vmem>>, vector<2x128xf32>
    tpu.vector_store %arg11[%c0_47, %c0_48], %92 {strides = array<i32>} : memref<2x128xf32, #tpu.memory_space<vmem>>, vector<2x128xf32>,
    return
  }
}

</mosaic_0001>

<bundles_post_ra>
// kernel: drug_forward.1
= control target key start
LH: loop header
LB: loop body
LE: loop exit
PB: predicated region body
PF: predicated region fallthrough
CT: control target
= control target key end

     0   :  { %vm44_vm0 = vcmask 261120   ;;  %vm135_vm1 = vcmask 130048   ;;  %vm227_vm2 = vcmask 523264   ;;  %v933_v32 = vmov 0   ;;  %s937_s20 = smov 64   ;;  %s1171_s3 = inlined_call_operand.vmem [shape: f32[32,64], index: 3, kind: input, shape index: {}]   ;;  %s1172_s1 = inlined_call_operand.vmem [shape: f32[16,32], index: 1, kind: input, shape index: {}]   ;;  %s1173_s0 = inlined_call_operand.vmem [shape: f32[16,16], index: 0, kind: input, shape index: {}]   ;;  %s1174_s5 = inlined_call_operand.vmem [shape: f32[64,64], index: 5, kind: input, shape index: {}]   ;;  %s1175_s4 = inlined_call_operand.vmem [shape: f32[1,64], index: 4, kind: input, shape index: {}]   ;;  %s1176_s2 = inlined_call_operand.vmem [shape: s32[16,1], index: 2, kind: input, shape index: {}]   ;;  %s1177_s7 = inlined_call_operand.vmem [shape: f32[128,32], index: 7, kind: input, shape index: {}]   ;;  %s1178_s6 = inlined_call_operand.vmem [shape: f32[1,64], index: 6, kind: input, shape index: {}]   ;;  %s1179_s9 = inlined_call_operand.vmem [shape: f32[32,128], index: 9, kind: input, shape index: {}]   ;;  %s1180_s8 = inlined_call_operand.vmem [shape: f32[1,32], index: 8, kind: input, shape index: {}]   ;;  %s1181_s10 = inlined_call_operand.vmem [shape: f32[1,128], index: 10, kind: input, shape index: {}]   ;;  %s1182_s11 = inlined_call_operand.vmem [shape: f32[2,128], index: 11, kind: output, shape index: {}]  }
   0x1   :  { %v40_v0 = vld [vmem:[%s1171_s3] sm:$0xff]  ;;  %v41_v1 = vld [vmem:[%s1171_s3 + $0x8] sm:$0xff]  ;;  %v42_v2 = vld [vmem:[%s1171_s3 + $0x10] sm:$0xff]  ;;  %928 = vset.pattern.permute.xlu1 %v933_v32  ;;  %927 = vset.pattern.permute.xlu0 %v933_v32  ;;  %vm401_vm3 = vcmask 7168   ;;  %v934_v36 = vmov 0.0   ;;  %vm936_vm14 = vmmov 0  }
   0x2   :  { %v860_v3 = vpack.c.bf16 %v41_v1, %v40_v0  ;;  %v43_v4 = vld [vmem:[%s1171_s3 + $0x18] sm:$0xff]  ;;  %v38_v5 = vld [vmem:[%s1172_s1] sm:$0xff]  ;;  %v39_v7 = vld [vmem:[%s1172_s1 + $0x8] sm:$0xff]  ;;  %vm516_vm15 = vcmask 1040384  }
   0x3   :  { %v864_v6 = vpack.c.bf16 %v43_v4, %v42_v2  ;;  %778 = vmatprep.mubr.msk.f32.mxu1 %vm44_vm0, %v38_v5  ;;  %v126_v8 = vld [vmem:[%s1173_s0] sm:$0xff]  ;;  %v220_v10 = vld [vmem:[%s1174_s5 + $0x8] sm:$0xff]  ;;  %v221_v15 = vld [vmem:[%s1174_s5 + $0x10] sm:$0xff] }
   0x4   :  { %861 = vmatprep.subr.bf16.mxu1 %v860_v3  ;;  %811 = vmatprep.mubr.msk.f32.mxu0 %vm135_vm1, %v126_v8  ;;  %v219_v9 = vld [vmem:[%s1174_s5] sm:$0xff]  ;;  %v222_v16 = vld [vmem:[%s1174_s5 + $0x18] sm:$0xff]  ;;  %v1038_v17 = vld [vmem:[%s1173_s0 + $0x8] sm:$0xff] }
   0x5   :  { %863 = vmatpush3.bf16.msra.mxu1 %v860_v3  ;;  %v872_v14 = vpack.c.bf16 %v220_v10, %v219_v9  ;;  %v876_v18 = vpack.c.bf16 %v222_v16, %v221_v15  ;;  %v223_v19 = vld [vmem:[%s1174_s5 + $0x20] sm:$0xff]  ;;  %v224_v20 = vld [vmem:[%s1174_s5 + $0x28] sm:$0xff]  ;;  %v225_v22 = vld [vmem:[%s1174_s5 + $0x30] sm:$0xff] }
   0x6   :  { %865 = vmatprep.subr.bf16.mxu1 %v864_v6  ;;  %v880_v21 = vpack.c.bf16 %v224_v20, %v223_v19  ;;  %v226_v23 = vld [vmem:[%s1174_s5 + $0x38] sm:$0xff]  ;;  %v709_v25 = vld [vmem:[%s1175_s4] ss:$0 sm:$0xff]  ;;  %v394_v34 = vld [vmem:[%s1176_s2 + $0x8] sm:$0xff] }
   0x7   :  { %v884_v24 = vpack.c.bf16 %v226_v23, %v225_v22  ;;  %v393_v33 = vld [vmem:[%s1176_s2] sm:$0xff]  ;;  %vm457_vm6 = vcmp.eq.s32.totalorder %v394_v34, 1  ;;  %vm396_vm7 = vcmp.eq.s32.totalorder %v394_v34, 0  ;;  %v525_v9 = vld [vmem:[%s1177_s7 + $0x8] sm:$0xff]  ;;  %v526_v10 = vld [vmem:[%s1177_s7 + $0x10] sm:$0xff] }
   0x8   :  { %vm456_vm4 = vcmp.eq.s32.totalorder %v393_v33, 1  ;;  %vm395_vm5 = vcmp.eq.s32.totalorder %v393_v33, 0  ;;  %v720_v42 = vsel %vm457_vm6, 1.0, %v934_v36  ;;  %v459_v43 = vsel %vm457_vm6, 1, %v933_v32  ;;  %v529_v15 = vld [vmem:[%s1177_s7 + $0x28] sm:$0xff]  ;;  %v532_v20 = vld [vmem:[%s1177_s7 + $0x40] sm:$0xff] }
   0x9   :  { %867 = vmatpush3.bf16.msra.mxu1 %v864_v6  ;;  %v458_v35 = vsel %vm456_vm4, 1, %v933_v32  ;;  %v719_v37 = vsel %vm456_vm4, 1.0, %v934_v36  ;;  %v397_v38 = vsel %vm395_vm5, 1, %v933_v32  ;;  %v717_v39 = vsel %vm395_vm5, 1.0, %v934_v36  ;;  %v534_v23 = vld [vmem:[%s1177_s7 + $0x50] sm:$0xff] }
   0xa   :  { %v462_v40 = vsel %vm401_vm3, %v719_v37, 0.0  ;;  %472 = vperm.xlu1 %928, %v458_v35   ;;  %v402_v41 = vsel %vm401_vm3, %v717_v39, 0.0  ;;  %412 = vperm.xlu0 %927, %v397_v38   ;;  %v463_v44 = vsel %vm401_vm3, %v720_v42, 0.0  ;;  %v398_v45 = vsel %vm396_vm7, 1, %v933_v32  ;;  %v714_v34 = vld [vmem:[%s1178_s6] ss:$0 sm:$0xff] }
   0xb   :  { %v718_v46 = vsel %vm396_vm7, 1.0, %v934_v36  ;;  %v464_v47 = vadd.f32 %v463_v44, %v462_v40 }
   0xc   :  { %779 = vmatmul.mubr.msk.f32.vlgmr.msra.gmra.mrb[0].mxu1 %vm44_vm0, %v39_v7  ;;  %v403_v48 = vsel %vm401_vm3, %v718_v46, 0.0  ;;  %v935_v7 = vmov 0.0|0.0  }
   0xd   :  { %785 = vmatprep.mubr.msk.f32.mxu1 %vm135_vm1, %v126_v8  ;;  %v404_v49 = vadd.f32 %v403_v48, %v402_v41  ;;  %v465_v50 = vrot.slane %v464_v47, 4  ;;  %v524_v8 = vld [vmem:[%s1177_s7] sm:$0xff] }
   0xe   :  { %475 = vperm.xlu1 %928, %v459_v43   ;;  %415 = vperm.xlu0 %927, %v398_v45  }
   0xf   :  { %v405_v51 = vrot.slane %v404_v49, 4  ;;  %v466_v52 = vadd.f32 %v465_v50, %v464_v47 }
  0x11   :  { %v406_v53 = vadd.f32 %v405_v51, %v404_v49  ;;  %v467_v54 = vrot.slane %v466_v52, 2 }
  0x13   :  { %v407_v55 = vrot.slane %v406_v53, 2  ;;  %v468_v56 = vadd.f32 %v467_v54, %v466_v52 }
  0x15   :  { %v408_v57 = vadd.f32 %v407_v55, %v406_v53  ;;  %v469_v58 = vrot.slane %v468_v56, 1 }
  0x17   :  { %v409_v59 = vrot.slane %v408_v57, 1  ;;  %v470_v60 = vadd.f32 %v469_v58, %v468_v56 }
  0x19   :  { %v410_v61 = vadd.f32 %v409_v59, %v408_v57  ;;  %v508_v62 = vmax.f32 %v470_v60, 1.0  ;;  %vm490_vm8 = vcmp.gt.f32.partialorder %v470_v60, 0.0 }
  0x1a   :  { %v491_v2 = vsel %vm490_vm8, 1, %v933_v32 }
  0x1b   :  { %v448_v63 = vmax.f32 %v410_v61, 1.0  ;;  %929 = vrcp.f32 %v508_v62  ;;  %vm430_vm9 = vcmp.gt.f32.partialorder %v410_v61, 0.0 }
  0x1c   :  { %v431_v3 = vsel %vm430_vm9, 1, %v933_v32 }
  0x1d   :  { %931 = vrcp.f32 %v448_v63 }
  0x25   :  { %v930_v0 = vpop.eup %929 }
  0x26   :  { %512 = vperm.xlu1 %928, %v930_v0  }
  0x27   :  { %v932_v1 = vpop.eup %931 }
  0x28   :  { %452 = vperm.xlu0 %927, %v932_v1  }
  0x2a   :  { %493 = vperm.xlu1 %928, %v491_v2  }
  0x2c   :  { %433 = vperm.xlu0 %927, %v431_v3  }
  0x89   :  { %v473_v32 = vpop.permute.xlu1 %472  ;;  %v413_v33 = vpop.permute.xlu0 %412 }
  0x8a   :  { %vm477_vm10 = vcmp.eq.s32.totalorder %v473_v32, 1  ;;  %vm417_vm11 = vcmp.eq.s32.totalorder %v413_v33, 1 }
  0x8d   :  { %v476_v40 = vpop.permute.xlu1 %475  ;;  %v416_v41 = vpop.permute.xlu0 %415 }
  0x8e   :  { %vm478_vm12 = vcmp.eq.s32.totalorder %v476_v40, 1  ;;  %vm418_vm13 = vcmp.eq.s32.totalorder %v416_v41, 1  ;;  %v621_v40 = vld [vmem:[%s1179_s9 + $0x18] sm:$0xff] }
  0xdf   :  { %v780_v11 = vpop.f32.mrb[0].mxu1 }
  0xe0   :  { %v117_v12 = vpop.f32.mrb[1].mxu1 }
  0xe1   :  { %v868_v13 = vpack.c.bf16 %v780_v11, %v117_v12  ;;  %v893_v11 = vpack.c.bf16 %v525_v9, %v524_v8  ;;  %v527_v12 = vld [vmem:[%s1177_s7 + $0x18] sm:$0xff] }
  0xe3   :  { %869 = vmatprep.subr.bf16.mxu1 %v868_v13 }
  0xe4   :  { %871 = vmatpush3.bf16.msra.mxu1 %v868_v13  ;;  %v896_v13 = vpack.c.bf16 %v527_v12, %v526_v10 }
  0xe5   :  { %873 = vmatprep.subr.bf16.mxu1 %v872_v14 }
  0xe7   :  { %786 = vmatmul.mubr.msk.f32.vlgmr.msra.gmra.mrb[2].mxu1 %vm135_vm1, %v1038_v17 }
  0xe8   :  { %875 = vmatpush3.bf16.msra.mxu1 %v872_v14  ;;  %v528_v14 = vld [vmem:[%s1177_s7 + $0x20] sm:$0xff] }
  0xe9   :  { %877 = vmatprep.subr.bf16.mxu1 %v876_v18  ;;  %v899_v16 = vpack.c.bf16 %v529_v15, %v528_v14  ;;  %v618_v15 = vld [vmem:[%s1179_s9] sm:$0xff] }
  0xec   :  { %879 = vmatpush3.bf16.msra.mxu1 %v876_v18  ;;  %v531_v18 = vld [vmem:[%s1177_s7 + $0x38] sm:$0xff] }
  0xed   :  { %881 = vmatprep.subr.bf16.mxu1 %v880_v21 }
  0xf0   :  { %883 = vmatpush3.bf16.msra.mxu1 %v880_v21  ;;  %v533_v21 = vld [vmem:[%s1177_s7 + $0x48] sm:$0xff] }
  0xf1   :  { %885 = vmatprep.subr.bf16.mxu1 %v884_v24  ;;  %v905_v22 = vpack.c.bf16 %v533_v21, %v532_v20 }
  0xf4   :  { %887 = vmatpush3.bf16.msra.mxu1 %v884_v24  ;;  %v535_v24 = vld [vmem:[%s1177_s7 + $0x58] sm:$0xff] }
  0xf5   :  { %916 = vmatprep.subr.bf16.mxu1 %v935_v7 }
 0x1ba   :  { %v787_v26 = vpop.f32.mrb[2].mxu1 }
 0x1bb   :  { %v214_v27 = vadd.f32 %v787_v26, %v709_v25  ;;  %v208_v28 = vpop.f32.mrb[3].mxu1  ;;  %v536_v26 = vld [vmem:[%s1177_s7 + $0x60] sm:$0xff] }
 0x1bc   :  { %v209_v29 = vadd.f32 %v709_v25, %v208_v28  ;;  %v908_v25 = vpack.c.bf16 %v535_v24, %v534_v23 }
 0x1bd   :  { %v218_v31 = vmax.f32 %v214_v27, 0.0  ;;  %v537_v27 = vld [vmem:[%s1177_s7 + $0x68] sm:$0xff] }
 0x1be   :  { %v217_v30 = vmax.f32 %v209_v29, 0.0  ;;  %v911_v28 = vpack.c.bf16 %v537_v27, %v536_v26  ;;  %v538_v29 = vld [vmem:[%s1177_s7 + $0x70] sm:$0xff] }
 0x1c0   :  { %804 = vmatprep.mubr.msk.f32.mxu1 %vm227_vm2, %v217_v30  ;;  %v539_v30 = vld [vmem:[%s1177_s7 + $0x78] sm:$0xff] }
 0x1c1   :  { %805 = vmatmul.mubr.msk.f32.vlgmr.msra.gmra.mrb[4].mxu1 %vm227_vm2, %v218_v31  ;;  %v914_v31 = vpack.c.bf16 %v539_v30, %v538_v29 }
 0x1c2   :  { %857 = vmatprep.mubr.msk.f32.mxu1 %vm936_vm14, %v934_v36 }
 0x294   :  { %v806_v4 = vpop.f32.mrb[4].mxu1 }
 0x295   :  { %v300_v5 = vpop.f32.mrb[5].mxu1 }
 0x296   :  { %v888_v6 = vpack.c.bf16 %v806_v4, %v300_v5  ;;  %v513_v4 = vpop.permute.xlu1 %512  ;;  %v453_v5 = vpop.permute.xlu0 %452 }
 0x298   :  { %889 = vmatprep.subr.bf16.mxu0 %v888_v6 }
 0x299   :  { %891 = vmatpush3.bf16.msra.mxu0 %v888_v6 }
 0x29a   :  { %892 = vmatprep.subr.bf16.mxu0 %v935_v7 }
 0x29c   :  { %812 = vmatmul.mubr.msk.f32.vlgmr.msra.gmra.mrb[0].mxu0 %vm135_vm1, %v1038_v17  ;;  %v530_v17 = vld [vmem:[%s1177_s7 + $0x30] sm:$0xff] }
 0x29d   :  { %894 = vmatpush3.bf16.msra.mxu0 %v893_v11  ;;  %v902_v19 = vpack.c.bf16 %v531_v18, %v530_v17  ;;  %846 = vmatprep.mubr.msk.f32.mxu0 %vm936_vm14, %v934_v36  ;;  %v434_v36 = vpop.permute.xlu0 %433 }
 0x29e   :  { %895 = vmatprep.subr.bf16.mxu0 %v935_v7  ;;  %vm435_vm3 = vcmp.eq.s32.totalorder %v434_v36, 1 }
 0x2a1   :  { %897 = vmatpush3.bf16.msra.mxu0 %v896_v13 }
 0x2a2   :  { %898 = vmatprep.subr.bf16.mxu0 %v935_v7 }
 0x2a5   :  { %900 = vmatpush3.bf16.msra.mxu0 %v899_v16  ;;  %v619_v16 = vld [vmem:[%s1179_s9 + $0x8] sm:$0xff] }
 0x2a6   :  { %901 = vmatprep.subr.bf16.mxu0 %v935_v7  ;;  %v917_v17 = vpack.c.bf16 %v619_v16, %v618_v15 }
 0x2a8   :  { %918 = vmatpush3.bf16.msra.mxu1 %v917_v17 }
 0x2a9   :  { %903 = vmatpush3.bf16.msra.mxu0 %v902_v19  ;;  %919 = vmatprep.subr.bf16.mxu1 %v935_v7 }
 0x2aa   :  { %904 = vmatprep.subr.bf16.mxu0 %v935_v7 }
 0x2ad   :  { %906 = vmatpush3.bf16.msra.mxu0 %v905_v22  ;;  %v494_v22 = vpop.permute.xlu1 %493 }
 0x2ae   :  { %907 = vmatprep.subr.bf16.mxu0 %v935_v7  ;;  %vm495_vm1 = vcmp.eq.s32.totalorder %v494_v22, 1 }
 0x2b1   :  { %909 = vmatpush3.bf16.msra.mxu0 %v908_v25 }
 0x2b2   :  { %910 = vmatprep.subr.bf16.mxu0 %v935_v7 }
 0x2b5   :  { %912 = vmatpush3.bf16.msra.mxu0 %v911_v28 }
 0x2b6   :  { %913 = vmatprep.subr.bf16.mxu0 %v935_v7  ;;  %v620_v7 = vld [vmem:[%s1179_s9 + $0x10] sm:$0xff] }
 0x2b7   :  { %v920_v41 = vpack.c.bf16 %v621_v40, %v620_v7 }
 0x2b9   :  { %915 = vmatpush3.bf16.msra.mxu0 %v914_v31  ;;  %921 = vmatpush3.bf16.msra.mxu1 %v920_v41 }
 0x36f   :  { %v813_v35 = vpop.f32.mrb[0].mxu0 }
 0x370   :  { %v388_v37 = vadd.f32 %v813_v35, %v714_v34  ;;  %v382_v38 = vpop.f32.mrb[1].mxu0 }
 0x371   :  { %v383_v39 = vadd.f32 %v714_v34, %v382_v38 }
 0x372   :  { %v392_v42 = vmax.f32 %v388_v37, 0.0 }
 0x373   :  { %v391_v43 = vmax.f32 %v383_v39, 0.0 }
 0x374   :  { %v420_v44 = vsel %vm418_vm13, %v392_v42, -inf  ;;  %v438_v45 = vsel %vm418_vm13, %v392_v42, 0.0  ;;  %v480_v46 = vsel %vm478_vm12, %v392_v42, -inf  ;;  %v498_v47 = vsel %vm478_vm12, %v392_v42, 0.0  ;;  %v721_v42 = vld [vmem:[%s1180_s8] ss:$0 sm:$0xff] }
 0x375   :  { %v422_v48 = vsel %vm227_vm2, %v420_v44, -inf  ;;  %v440_v49 = vsel %vm227_vm2, %v438_v45, 0.0  ;;  %v482_v50 = vsel %vm227_vm2, %v480_v46, -inf  ;;  %v500_v51 = vsel %vm227_vm2, %v498_v47, 0.0  ;;  %v722_v47 = vld [vmem:[%s1181_s10] ss:$0 sm:$0xff] }
 0x376   :  { %v419_v52 = vsel %vm417_vm11, %v391_v43, -inf  ;;  %v437_v53 = vsel %vm417_vm11, %v391_v43, 0.0  ;;  %v479_v54 = vsel %vm477_vm10, %v391_v43, -inf  ;;  %v497_v55 = vsel %vm477_vm10, %v391_v43, 0.0 }
 0x377   :  { %v421_v56 = vsel %vm227_vm2, %v419_v52, -inf  ;;  %v439_v57 = vsel %vm227_vm2, %v437_v53, 0.0  ;;  %v481_v58 = vsel %vm227_vm2, %v479_v54, -inf  ;;  %v499_v59 = vsel %vm227_vm2, %v497_v55, 0.0 }
 0x378   :  { %v423_v60 = vmax.f32 %v421_v56, %v422_v48  ;;  %v441_v61 = vadd.f32 %v440_v49, %v439_v57  ;;  %v483_v62 = vmax.f32 %v481_v58, %v482_v50  ;;  %v501_v63 = vadd.f32 %v500_v51, %v499_v59 }
 0x37a   :  { %v424_v0 = vrot.slane %v423_v60, 4  ;;  %v442_v1 = vrot.slane %v441_v61, 4  ;;  %v484_v2 = vrot.slane %v483_v62, 4  ;;  %v502_v3 = vrot.slane %v501_v63, 4 }
 0x37c   :  { %v443_v6 = vadd.f32 %v442_v1, %v441_v61  ;;  %v503_v8 = vadd.f32 %v502_v3, %v501_v63  ;;  %v485_v9 = vmax.f32 %v483_v62, %v484_v2  ;;  %v425_v10 = vmax.f32 %v423_v60, %v424_v0 }
 0x37e   :  { %v444_v11 = vrot.slane %v443_v6, 2  ;;  %v504_v12 = vrot.slane %v503_v8, 2  ;;  %v486_v13 = vrot.slane %v485_v9, 2  ;;  %v426_v14 = vrot.slane %v425_v10, 2 }
 0x380   :  { %v445_v18 = vadd.f32 %v444_v11, %v443_v6  ;;  %v505_v19 = vadd.f32 %v504_v12, %v503_v8  ;;  %v487_v20 = vmax.f32 %v485_v9, %v486_v13  ;;  %v427_v21 = vmax.f32 %v425_v10, %v426_v14 }
 0x382   :  { %v446_v23 = vrot.slane %v445_v18, 1  ;;  %v506_v24 = vrot.slane %v505_v19, 1  ;;  %v488_v25 = vrot.slane %v487_v20, 1  ;;  %v428_v26 = vrot.slane %v427_v21, 1 }
 0x384   :  { %v447_v27 = vadd.f32 %v446_v23, %v445_v18  ;;  %v507_v28 = vadd.f32 %v506_v24, %v505_v19  ;;  %v489_v29 = vmax.f32 %v487_v20, %v488_v25  ;;  %v429_v30 = vmax.f32 %v427_v21, %v428_v26 }
 0x386   :  { %v455_v31 = vmul.f32 %v453_v5, %v447_v27  ;;  %v515_v32 = vmul.f32 %v513_v4, %v507_v28  ;;  %v496_v33 = vsel %vm495_vm1, %v489_v29, 0.0  ;;  %v436_v34 = vsel %vm435_vm3, %v429_v30, 0.0 }
 0x387   :  { %v517_v35 = vsel %vm516_vm15, %v436_v34, %v496_v33 }
 0x388   :  { %v518_v37 = vsel %vm516_vm15, %v455_v31, %v515_v32 }
 0x389   :  { %520 = vrot.lane.b32.xlu0 %v518_v37, %s937_s20 }
 0x3fb   :  { %v521_v38 = vpop.permute.xlu0 %520 }
 0x3fc   :  { %v523_v39 = vsel %vm227_vm2, %v517_v35, %v521_v38 }
 0x3fd   :  { %847 = vmatmul.mubr.f32.vlgmr.msra.gmra.mrb[2].mxu0 %v523_v39 }
 0x4d0   :  { %v613_v43 = vpop.f32.mrb[2].mxu0 }
 0x4d1   :  { %v614_v44 = vadd.f32 %v721_v42, %v613_v43  ;;  %v848_v45 = vpop.f32.mrb[3].mxu0 }
 0x4d3   :  { %v617_v46 = vmax.f32 %v614_v44, 0.0 }
 0x4d5   :  { %858 = vmatmul.mubr.msk.f32.vlgmr.msra.gmra.mrb[6].mxu1 %vm44_vm0, %v617_v46 }
 0x5a8   :  { %v698_v48 = vpop.f32.mrb[6].mxu1 }
 0x5a9   :  { %v699_v49 = vadd.f32 %v722_v47, %v698_v48  ;;  %v859_v50 = vpop.f32.mrb[7].mxu1 }
 0x5ab   :  { %702 = vst [vmem:[%s1182_s11] sm:$0x3] %v699_v49 }

</bundles_post_ra>
